<compile_context>
chip_gen: v5e
topology: v5e:2x2
jax: 0.10.0
libtpu: 0.0.40
codegen_flags: <defaults>
</compile_context>

<pallas_src>
import functools
import math

import numpy as np
import jax
import jax.numpy as jnp
from jax.experimental import pallas as pl
from jax.experimental.pallas import tpu as pltpu

# ----------------------------- small synthetic config -----------------------------
B = 2            # batch
C_IN = 1         # dataset in_channels
L = 64           # input_length
N_FFT = 8
HOP = N_FFT // 4                 # torch.stft default hop
N_BINS = N_FFT // 2 + 1          # onesided freq bins
N_FRAMES = L // HOP + 1          # torch.stft center=True frame count
DIM = 32                         # encoder dim == codebook dim
N_RESBLOCKS = 1
DS_L = 4                         # downsample rate (width stride) LF
DS_H = 2                         # downsample rate (width stride) HF
CODEBOOK_L = 16
CODEBOOK_H = 16
MASK_TOKEN_L = CODEBOOK_L        # mask_token_ids['LF']
MASK_TOKEN_H = CODEBOOK_H        # mask_token_ids['HF']
N_CLASSES = 4
D_T = 64                         # transformer width
D_FF = 4 * D_T
VPAD = 128                       # lane-padded head vocab width


def _conv_out(w, stride):
    return (w + 2 - 3) // stride + 1


H_PRIME = _conv_out(N_BINS, 1)           # 5
W_PRIME_L = _conv_out(N_FRAMES, DS_L)    # 9
W_PRIME_H = _conv_out(N_FRAMES, DS_H)    # 17
N_TOK_L = H_PRIME * W_PRIME_L            # 45
N_TOK_H = H_PRIME * W_PRIME_H            # 85


def _full_spec(shape):
    # whole-array block, constant index map (valid for any grid rank because Pallas only
    # passes the grid indices positionally).
    return pl.BlockSpec(shape, lambda *_, _n=len(shape): (0,) * _n)


# ----------------------------- Pallas kernels -----------------------------
def _mm_bias_kernel(x_ref, w_ref, b_ref, o_ref):
    o_ref[...] = (jnp.dot(x_ref[...], w_ref[...], preferred_element_type=jnp.float32)
                  + b_ref[...])


def mm_bias(x, w, b):
    """Small whole-array matmul (only used for the tiny fused DFT; all other matmuls live
    inside the fused encoder / transformer kernels, whose operands fit VMEM with margin)."""
    M, K = x.shape
    Kw, N = w.shape
    assert K == Kw
    b2 = jnp.asarray(b, jnp.float32).reshape(1, N)
    return pl.pallas_call(
        _mm_bias_kernel,
        grid=(1,),
        in_specs=[_full_spec((M, K)), _full_spec((K, N)), _full_spec((1, N))],
        out_specs=_full_spec((M, N)),
        out_shape=jax.ShapeDtypeStruct((M, N), jnp.float32),
    )(x.astype(jnp.bfloat16), w.astype(jnp.bfloat16), b2)


def _encoder_vq_kernel(p_ref, ring_ref, w1_ref, b1_ref, wa_ref, ba_ref, wb_ref, bb_ref,
                       cb_ref, e2_ref, idx_ref, *, wp2, n_res, dim, margin, rint):
    """Fused VQ-VAE encoder branch: conv1(+gelu) -> n_res x [conv+gelu+conv+residual] -> VQ argmin.

    Activations live on a flat "padded grid" of rint = B*(H'+2)*(W'+2) rows; the 3x3 conv is
    nine shifted row-slices (row offset = (dh-1)*wp2 + (dw-1)) each hitting the MXU with a
    (dim, dim) tap weight.  Ring/pad rows are re-zeroed via `ring` after every conv so they act
    as the zero padding of the next conv; their (garbage) VQ indices are discarded by the wrapper.
    """
    ring = ring_ref[...]                                            # (rint, 1) f32
    # conv1 (stride folded into the wrapper-side patch gather; Cin is tiny so that is cheap).
    y = jnp.dot(p_ref[...], w1_ref[...], preferred_element_type=jnp.float32) + b1_ref[...]
    y = jax.nn.gelu(y) * ring                                       # (rint, dim) f32

    wa = wa_ref[...]                                                # (n_res*9*dim, dim) bf16
    wb = wb_ref[...]
    ba = ba_ref[...]                                                # (n_res, dim) f32
    bb = bb_ref[...]
    zpad = jnp.zeros((margin, dim), jnp.bfloat16)
    offs = [(dh - 1) * wp2 + (dw - 1) for dh in range(3) for dw in range(3)]

    for r in range(n_res):
        ybuf = jnp.concatenate([zpad, y.astype(jnp.bfloat16), zpad], axis=0)
        acc = jnp.zeros((rint, dim), jnp.float32)
        for k, off in enumerate(offs):
            w_k = wa[(r * 9 + k) * dim:(r * 9 + k + 1) * dim, :]
            acc = acc + jnp.dot(ybuf[margin + off:margin + off + rint, :], w_k,
                                preferred_element_type=jnp.float32)
        h = jax.nn.gelu(acc + ba[r:r + 1, :]) * ring

        hbuf = jnp.concatenate([zpad, h.astype(jnp.bfloat16), zpad], axis=0)
        acc2 = jnp.zeros((rint, dim), jnp.float32)
        for k, off in enumerate(offs):
            w_k = wb[(r * 9 + k) * dim:(r * 9 + k + 1) * dim, :]
            acc2 = acc2 + jnp.dot(hbuf[margin + off:margin + off + rint, :], w_k,
                                  preferred_element_type=jnp.float32)
        y = y + (acc2 + bb[r:r + 1, :]) * ring

    # Vector-quantize: distances laid out (Kc, rint) so the argmin output is lane-dense (1, rint).
    zt = y.astype(jnp.bfloat16)
    dots = jax.lax.dot_general(cb_ref[...], zt, (((1,), (1,)), ((), ())),
                               preferred_element_type=jnp.float32)  # (Kc, rint)
    # ||z||^2 omitted (constant per column, does not change the argmin).
    dist = e2_ref[...] - 2.0 * dots
    min_d = jnp.min(dist, axis=0, keepdims=True)
    iota = jax.lax.broadcasted_iota(jnp.int32, dist.shape, 0)
    idx = jnp.min(jnp.where(dist <= min_d, iota, jnp.int32(2 ** 30)), axis=0, keepdims=True)
    idx_ref[...] = idx                                              # (1, rint) int32, lane-dense


def _mask_kernel(rand_ref, thr_ref, s_ref, o_ref, *, mask_token):
    # keep the token iff its random draw is among the top-n_masks of its row
    # (threshold = n_masks-th largest value, precomputed in the wrapper).
    keep = rand_ref[...] >= thr_ref[...]
    # exactly reproduces: s_M = mask * s + ~mask * mask_token  (mask True at topk positions)
    o_ref[...] = jnp.where(keep, s_ref[...], jnp.int32(mask_token))


def mask_tokens(rand, s, n_masks, mask_token):
    Bm, N = s.shape
    n_masks = int(n_masks)
    if n_masks <= 0:
        thr = jnp.full((Bm, 1), jnp.inf, jnp.float32)
    else:
        topv, _ = jax.lax.top_k(rand, min(n_masks, N))
        thr = topv[:, n_masks - 1:n_masks]
    return pl.pallas_call(
        functools.partial(_mask_kernel, mask_token=int(mask_token)),
        grid=(1,),
        in_specs=[_full_spec((Bm, N)), _full_spec((Bm, 1)), _full_spec((Bm, N))],
        out_specs=_full_spec((Bm, N)),
        out_shape=jax.ShapeDtypeStruct((Bm, N), jnp.int32),
    )(rand.astype(jnp.float32), thr, s.astype(jnp.int32))


def _xfmr_kernel(x_ref, wqkv_ref, wo_ref, w1_ref, b1_ref, w2_ref, b2_ref,
                 g1_ref, be1_ref, g2_ref, be2_ref, hw_ref, hb_ref, o_ref, *, scale, dim):
    """Fused pre-LN transformer block + classification head (one batch element per grid step).
    MXU operands in bf16, all LN/softmax/gelu math in f32 (v5e has no bf16 VPU/EUP path)."""
    x = x_ref[0]                                     # (N, D) f32

    def ln(v, g, b):
        mu = jnp.mean(v, axis=-1, keepdims=True)
        var = jnp.mean((v - mu) ** 2, axis=-1, keepdims=True)
        return (v - mu) * jax.lax.rsqrt(var + 1e-5) * g + b

    xn = ln(x, g1_ref[...], be1_ref[...])
    qkv = jnp.dot(xn.astype(jnp.bfloat16), wqkv_ref[...],
                  preferred_element_type=jnp.float32)               # (N, 3D), single MXU push
    q = qkv[:, :dim]
    k = qkv[:, dim:2 * dim]
    v = qkv[:, 2 * dim:]
    scores = jax.lax.dot_general(q.astype(jnp.bfloat16), k.astype(jnp.bfloat16),
                                 (((1,), (1,)), ((), ())),
                                 preferred_element_type=jnp.float32) * scale
    m = jnp.max(scores, axis=-1, keepdims=True)
    p = jnp.exp(scores - m)
    att = p * pl.reciprocal(jnp.sum(p, axis=-1, keepdims=True), approx=True)
    a = jnp.dot(att.astype(jnp.bfloat16), v.astype(jnp.bfloat16),
                preferred_element_type=jnp.float32)
    h = x + jnp.dot(a.astype(jnp.bfloat16), wo_ref[...], preferred_element_type=jnp.float32)
    hn = ln(h, g2_ref[...], be2_ref[...])
    ff = jax.nn.gelu(jnp.dot(hn.astype(jnp.bfloat16), w1_ref[...],
                             preferred_element_type=jnp.float32) + b1_ref[...])
    out = h + jnp.dot(ff.astype(jnp.bfloat16), w2_ref[...],
                      preferred_element_type=jnp.float32) + b2_ref[...]
    # fused head; vocab padded to 128 lanes -> unmasked stores (wrapper slices the real vocab)
    o_ref[0] = (jnp.dot(out.astype(jnp.bfloat16), hw_ref[...],
                        preferred_element_type=jnp.float32) + hb_ref[...])


def transformer_core(x, blk, head_w, head_b):
    Bx, N, D = x.shape
    Dff = blk['w1'].shape[1]
    V = head_w.shape[1]
    wqkv = jnp.concatenate([blk['wq'], blk['wk'], blk['wv']], axis=1).astype(jnp.bfloat16)
    hw = jnp.zeros((D, VPAD), jnp.float32).at[:, :V].set(head_w).astype(jnp.bfloat16)
    hb = jnp.zeros((1, VPAD), jnp.float32).at[:, :V].set(head_b.reshape(1, V))

    logits = pl.pallas_call(
        functools.partial(_xfmr_kernel, scale=1.0 / math.sqrt(D), dim=D),
        grid=(Bx,),
        in_specs=[pl.BlockSpec((1, N, D), lambda b: (b, 0, 0)),
                  _full_spec((D, 3 * D)), _full_spec((D, D)),
                  _full_spec((D, Dff)), _full_spec((1, Dff)),
                  _full_spec((Dff, D)), _full_spec((1, D)),
                  _full_spec((1, D)), _full_spec((1, D)),
                  _full_spec((1, D)), _full_spec((1, D)),
                  _full_spec((D, VPAD)), _full_spec((1, VPAD))],
        out_specs=pl.BlockSpec((1, N, VPAD), lambda b: (b, 0, 0)),
        out_shape=jax.ShapeDtypeStruct((Bx, N, VPAD), jnp.float32),
        compiler_params=pltpu.CompilerParams(dimension_semantics=("parallel",)),
    )(x.astype(jnp.float32), wqkv, blk['wo'].astype(jnp.bfloat16),
      blk['w1'].astype(jnp.bfloat16), blk['b1'],
      blk['w2'].astype(jnp.bfloat16), blk['b2'],
      blk['g1'], blk['be1'], blk['g2'], blk['be2'], hw, hb)
    return logits[:, :, :V]


# ----------------------------- model pieces (glue + kernels) -----------------------------
def time_to_timefreq(x):
    """x: (B, C, L) -> xf: (B, 2*C, N_BINS, N_FRAMES) (torch.stft-style, real/imag per channel)."""
    Bx, C, Lx = x.shape
    pad = N_FFT // 2
    xr = x.reshape(Bx * C, Lx)
    xp = jnp.pad(xr, ((0, 0), (pad, pad)), mode='reflect')           # center=True
    idx = np.arange(N_FRAMES)[:, None] * HOP + np.arange(N_FFT)[None, :]
    frames = xp[:, idx]                                              # (B*C, N_FRAMES, N_FFT)
    flat = frames.reshape(Bx * C * N_FRAMES, N_FFT)
    n = np.arange(N_FFT)[:, None]
    k = np.arange(N_BINS)[None, :]
    ang = -2.0 * np.pi * n * k / N_FFT
    dft = jnp.asarray(np.concatenate([np.cos(ang), np.sin(ang)], axis=1), jnp.float32)
    out = mm_bias(flat, dft, jnp.zeros((2 * N_BINS,), jnp.float32))  # fused real+imag DFT
    real = out[:, :N_BINS].reshape(Bx, C, N_FRAMES, N_BINS)
    imag = out[:, N_BINS:].reshape(Bx, C, N_FRAMES, N_BINS)
    xf = jnp.stack([real, imag], axis=2)                             # (B, C, 2, N_FRAMES, N_BINS)
    xf = jnp.transpose(xf, (0, 1, 2, 4, 3))                          # (B, C, 2, N_BINS, N_FRAMES)
    return xf.reshape(Bx, 2 * C, N_BINS, N_FRAMES)                   # 'b (c z) n t'


def zero_pad_high_freq(xf):   # keep only freq bin 0 (LF)
    mask = (np.arange(N_BINS) == 0).astype(np.float32)[None, None, :, None]
    return xf * jnp.asarray(mask)


def zero_pad_low_freq(xf):    # zero out freq bin 0, keep the rest (HF)
    mask = (np.arange(N_BINS) >= 1).astype(np.float32)[None, None, :, None]
    return xf * jnp.asarray(mask)


def encode_to_s(xf_masked, enc, codebook, sw):
    """Masked spectrogram (NCHW) -> VQ token ids (B, H'*W') via one fused Pallas kernel."""
    x = jnp.transpose(xf_masked, (0, 2, 3, 1)).astype(jnp.float32)   # NCHW -> NHWC
    Bn, H, W, Cin = x.shape
    Hp = H                                                           # stride 1 in H
    Wp = (W + 2 - 3) // sw + 1
    Hp2, Wp2 = Hp + 2, Wp + 2
    R = Bn * Hp2 * Wp2

    # conv1 patches for EVERY padded-grid output position (ring rows are masked in-kernel).
    # padded input index: row = h' + dh, col = w' * sw + dw.
    pad_left = sw + 1
    pad_right = (Wp + 1) * sw + 3 - W - pad_left
    xp = jnp.pad(x, ((0, 0), (2, 2), (pad_left, pad_right), (0, 0)))
    cols = []
    for dh in range(3):
        for dw in range(3):
            cols.append(xp[:, dh:dh + Hp2, dw:dw + (Wp2 - 1) * sw + 1:sw, :])
    P = jnp.concatenate(cols, axis=-1).reshape(R, 9 * Cin).astype(jnp.bfloat16)

    rm = np.zeros((Hp2, Wp2), np.float32)
    rm[1:-1, 1:-1] = 1.0
    ring = jnp.asarray(np.tile(rm[None], (Bn, 1, 1)).reshape(R, 1))

    D = enc['w1'].shape[1]
    n_res = len(enc['resblocks'])
    w1 = enc['w1'].astype(jnp.bfloat16)
    b1 = enc['b1'].reshape(1, D)
    wa = jnp.concatenate([rb['w1'] for rb in enc['resblocks']], axis=0).astype(jnp.bfloat16)
    ba = jnp.stack([rb['b1'] for rb in enc['resblocks']], axis=0)
    wb = jnp.concatenate([rb['w2'] for rb in enc['resblocks']], axis=0).astype(jnp.bfloat16)
    bb = jnp.stack([rb['b2'] for rb in enc['resblocks']], axis=0)
    cb = codebook.astype(jnp.bfloat16)
    e2 = jnp.sum(jnp.asarray(codebook, jnp.float32) ** 2, axis=-1, keepdims=True)  # (Kc, 1)
    Kc = codebook.shape[0]
    margin = Wp2 + 1

    idx = pl.pallas_call(
        functools.partial(_encoder_vq_kernel, wp2=Wp2, n_res=n_res, dim=D,
                          margin=margin, rint=R),
        grid=(1,),
        in_specs=[_full_spec((R, 9 * Cin)), _full_spec((R, 1)),
                  _full_spec((9 * Cin, D)), _full_spec((1, D)),
                  _full_spec((n_res * 9 * D, D)), _full_spec((n_res, D)),
                  _full_spec((n_res * 9 * D, D)), _full_spec((n_res, D)),
                  _full_spec((Kc, D)), _full_spec((Kc, 1))],
        out_specs=_full_spec((1, R)),
        out_shape=jax.ShapeDtypeStruct((1, R), jnp.int32),
    )(P, ring, w1, b1, wa, ba, wb, bb, cb, e2)

    # drop ring/pad positions -> token ids in 'b (h w)' order
    s = idx.reshape(Bn, Hp2, Wp2)[:, 1:-1, 1:-1].reshape(Bn, Hp * Wp)
    return s


def transformer_l_forward(s_M, y, p):
    tok = jnp.take(p['tok_emb'], s_M, axis=0)                        # (B, N, D_T)
    cls = jnp.take(p['cls_emb'], y[:, 0], axis=0)                    # (B, D_T)
    x = tok + p['pos_emb'][None] + cls[:, None, :]
    return transformer_core(x, p['block'], p['head_w'], p['head_b'])


def transformer_h_forward(s_l, s_h_M, y, p):
    Nl = s_l.shape[1]
    tok = jnp.concatenate([jnp.take(p['tok_emb_l'], s_l, axis=0),
                           jnp.take(p['tok_emb_h'], s_h_M, axis=0)], axis=1)
    cls = jnp.take(p['cls_emb'], y[:, 0], axis=0)
    x = tok + p['pos_emb'][None] + cls[:, None, :]
    logits_all = transformer_core(x, p['block'], p['head_w'], p['head_b'])
    return logits_all[:, Nl:, :]


def timevqvdm_forward(params, x, y, rng_key):
    """x: (B, C, L), y: (B, 1) int  ->  ([logits_l, logits_h], [target_l, target_h])."""
    xf = time_to_timefreq(x)                                         # STFT computed once
    s_l = encode_to_s(zero_pad_high_freq(xf), params['enc_l'], params['codebook_l'], DS_L)
    s_h = encode_to_s(zero_pad_low_freq(xf), params['enc_h'], params['codebook_h'], DS_H)

    # t = np.random.uniform(0, 1) with a fixed seed; gamma = cosine schedule.
    t = float(np.random.default_rng(0).uniform(0.0, 1.0))
    gamma_t = float(np.cos(t * np.pi / 2.0))
    n_masks_l = math.floor(gamma_t * s_l.shape[1])
    n_masks_h = math.floor(gamma_t * s_h.shape[1])

    k1, k2 = jax.random.split(rng_key)
    rand_l = jax.random.uniform(k1, s_l.shape)
    rand_h = jax.random.uniform(k2, s_h.shape)
    s_l_M = mask_tokens(rand_l, s_l, n_masks_l, MASK_TOKEN_L)
    s_h_M = mask_tokens(rand_h, s_h, n_masks_h, MASK_TOKEN_H)

    logits_l = transformer_l_forward(s_l_M, y, params['xfmr_l'])
    target_l = s_l
    logits_h = transformer_h_forward(s_l, s_h_M, y, params['xfmr_h'])  # unmasked s_l, as in the reference
    target_h = s_h
    return [logits_l, logits_h], [target_l, target_h]


# ----------------------------- deterministic parameter init -----------------------------
def init_params(key):
    keys = iter(jax.random.split(key, 64))

    def nrm(shape, std=0.02):
        return std * jax.random.normal(next(keys), shape, dtype=jnp.float32)

    def make_encoder():
        return {
            'w1': nrm((9 * 2 * C_IN, DIM)), 'b1': jnp.zeros((DIM,), jnp.float32),
            'resblocks': [{'w1': nrm((9 * DIM, DIM)), 'b1': jnp.zeros((DIM,), jnp.float32),
                           'w2': nrm((9 * DIM, DIM)), 'b2': jnp.zeros((DIM,), jnp.float32)}
                          for _ in range(N_RESBLOCKS)],
        }

    def make_block():
        return {'wq': nrm((D_T, D_T)), 'wk': nrm((D_T, D_T)), 'wv': nrm((D_T, D_T)),
                'wo': nrm((D_T, D_T)),
                'w1': nrm((D_T, D_FF)), 'b1': jnp.zeros((1, D_FF), jnp.float32),
                'w2': nrm((D_FF, D_T)), 'b2': jnp.zeros((1, D_T), jnp.float32),
                'g1': jnp.ones((1, D_T), jnp.float32), 'be1': jnp.zeros((1, D_T), jnp.float32),
                'g2': jnp.ones((1, D_T), jnp.float32), 'be2': jnp.zeros((1, D_T), jnp.float32)}

    params = {
        'enc_l': make_encoder(),
        'enc_h': make_encoder(),
        'codebook_l': nrm((CODEBOOK_L, DIM), std=1.0),
        'codebook_h': nrm((CODEBOOK_H, DIM), std=1.0),
        'xfmr_l': {
            'tok_emb': nrm((CODEBOOK_L + 1, D_T)),
            'pos_emb': nrm((N_TOK_L, D_T)),
            'cls_emb': nrm((N_CLASSES, D_T)),
            'block': make_block(),
            'head_w': nrm((D_T, CODEBOOK_L + 1)),
            'head_b': jnp.zeros((CODEBOOK_L + 1,), jnp.float32),
        },
        'xfmr_h': {
            'tok_emb_l': nrm((CODEBOOK_L + 1, D_T)),
            'tok_emb_h': nrm((CODEBOOK_H + 1, D_T)),
            'pos_emb': nrm((N_TOK_L + N_TOK_H, D_T)),
            'cls_emb': nrm((N_CLASSES, D_T)),
            'block': make_block(),
            'head_w': nrm((D_T, CODEBOOK_H + 1)),
            'head_b': jnp.zeros((CODEBOOK_H + 1,), jnp.float32),
        },
    }
    return params


# ----------------------------- main -----------------------------
if __name__ == "__main__":
    key = jax.random.PRNGKey(0)
    kp, kx, ky, km = jax.random.split(key, 4)
    params = init_params(kp)
    x = jax.random.normal(kx, (B, C_IN, L), dtype=jnp.float32)
    y = jax.random.randint(ky, (B, 1), 0, N_CLASSES, dtype=jnp.int32)

    (logits, targets) = timevqvdm_forward(params, x, y, km)
    jax.block_until_ready(logits)
    jax.block_until_ready(targets)

    assert logits[0].shape == (B, N_TOK_L, CODEBOOK_L + 1)
    assert logits[1].shape == (B, N_TOK_H, CODEBOOK_H + 1)
    assert targets[0].shape == (B, N_TOK_L) and targets[1].shape == (B, N_TOK_H)
    print("KERNEL_OK")
</pallas_src>

<mosaic_0001>
module attributes {stable_mosaic.version = 11 : i64} {
  func.func @_mm_bias_kernel(%arg0: i32, %arg1: memref<66x8xbf16, #tpu.memory_space<vmem>>, %arg2: memref<8x10xbf16, #tpu.memory_space<vmem>>, %arg3: memref<1x10xf32, #tpu.memory_space<vmem>>, %arg4: memref<66x10xf32, #tpu.memory_space<vmem>>) attributes {dimension_semantics = [#tpu.dimension_semantics<arbitrary>], iteration_bounds = array<i64: 1>, scalar_prefetch = 0 : i64, scratch_operands = 0 : i64, tpu.core_type = #tpu.core_type<tc>, window_params = [{pipeline_mode = #tpu.pipeline_mode<synchronous>, transform_indices = @transform_0, window_bounds = array<i64: 66, 8>}, {pipeline_mode = #tpu.pipeline_mode<synchronous>, transform_indices = @transform_1, window_bounds = array<i64: 8, 10>}, {pipeline_mode = #tpu.pipeline_mode<synchronous>, transform_indices = @transform_2, window_bounds = array<i64: 1, 10>}, {pipeline_mode = #tpu.pipeline_mode<synchronous>, transform_indices = @transform_3, window_bounds = array<i64: 66, 10>}]} {
    %c0 = arith.constant 0 : index
    %c0_0 = arith.constant 0 : index
    %0 = vector.load %arg1[%c0, %c0_0] : memref<66x8xbf16, #tpu.memory_space<vmem>>, vector<66x8xbf16>
    %c0_1 = arith.constant 0 : index
    %c0_2 = arith.constant 0 : index
    %1 = vector.load %arg2[%c0_1, %c0_2] : memref<8x10xbf16, #tpu.memory_space<vmem>>, vector<8x10xbf16>
    %cst = arith.constant dense<0.000000e+00> : vector<66x10xf32>
    %2 = tpu.matmul %0, %1, %cst {dimension_numbers = #tpu.dot_dimension_numbers<[1], [0], [0], [1], [0, 0, 1, 1], [], []>} : vector<66x8xbf16>, vector<8x10xbf16>, vector<66x10xf32> -> vector<66x10xf32>
    %c0_3 = arith.constant 0 : index
    %c0_4 = arith.constant 0 : index
    %3 = vector.load %arg3[%c0_3, %c0_4] : memref<1x10xf32, #tpu.memory_space<vmem>>, vector<1x10xf32>
    %4 = vector.broadcast %3 : vector<1x10xf32> to vector<66x10xf32>
    %5 = arith.addf %2, %4 : vector<66x10xf32>
    %c0_5 = arith.constant 0 : index
    %c0_6 = arith.constant 0 : index
    %6 = vector.load %arg4[%c0_5, %c0_6] : memref<66x10xf32, #tpu.memory_space<vmem>>, vector<66x10xf32>
    tpu.vector_store %arg4[%c0_5, %c0_6], %5 {strides = array<i32>} : memref<66x10xf32, #tpu.memory_space<vmem>>, vector<66x10xf32>,
    return
  }
  func.func @transform_0(%arg0: i32) -> (i32, i32) {
    %c0_i32 = arith.constant 0 : i32
    %c0_i32_0 = arith.constant 0 : i32
    %c0_i32_1 = arith.constant 0 : i32
    return %c0_i32, %c0_i32_0 : i32, i32
  }
  func.func @transform_1(%arg0: i32) -> (i32, i32) {
    %c0_i32 = arith.constant 0 : i32
    %c0_i32_0 = arith.constant 0 : i32
    %c0_i32_1 = arith.constant 0 : i32
    return %c0_i32, %c0_i32_0 : i32, i32
  }
  func.func @transform_2(%arg0: i32) -> (i32, i32) {
    %c0_i32 = arith.constant 0 : i32
    %c0_i32_0 = arith.constant 0 : i32
    %c0_i32_1 = arith.constant 0 : i32
    return %c0_i32, %c0_i32_0 : i32, i32
  }
  func.func @transform_3(%arg0: i32) -> (i32, i32) {
    %c0_i32 = arith.constant 0 : i32
    %c0_i32_0 = arith.constant 0 : i32
    %c0_i32_1 = arith.constant 0 : i32
    return %c0_i32, %c0_i32_0 : i32, i32
  }
}

</mosaic_0001>

<bundles_post_ra>
// kernel: tpu_custom_call.1
= control target key start
LH: loop header
LB: loop body
LE: loop exit
PB: predicated region body
PF: predicated region fallthrough
CT: control target
= control target key end

     0   :  { %vm68_vm0 = vcmask 1043456   ;;  %vm52_vm1 = vcmask 64512   ;;  %vm105_vm2 = vcmask 80896   ;;  %vm114_vm3 = vcmask 74752   ;;  %s225_s1 = inlined_call_operand.vmem [shape: bf16[8,10], index: 1, kind: input, shape index: {}]   ;;  %s226_s0 = inlined_call_operand.vmem [shape: bf16[66,8], index: 0, kind: input, shape index: {}]   ;;  %s227_s2 = inlined_call_operand.vmem [shape: f32[1,10], index: 2, kind: input, shape index: {}]   ;;  %s228_s3 = inlined_call_operand.vmem [shape: f32[66,10], index: 3, kind: output, shape index: {}]  }
   0x1   :  { %v24_v0 = vld [vmem:[%s225_s1] sm:$0xf]  ;;  %v143_v3 = vld [vmem:[%s226_s0 + $0x10] sm:$0xff]  ;;  %v142_v6 = vld [vmem:[%s226_s0 + $0x8] sm:$0xff] }
   0x2   :  { %v23_v1 = vld [vmem:[%s226_s0 + $0x20] sm:$0x1]  ;;  %v70_v2 = vsel %vm68_vm0, %v24_v0, 0  ;;  %v144_v8 = vld [vmem:[%s226_s0 + $0x18] sm:$0xff] }
   0x3   :  { %v46_v4 = vunpack.c.l.b16 %v23_v1  ;;  %146 = vmatpush.bf16.msra.mxu2 %v70_v2  ;;  %147 = vmatpush.bf16.msra.mxu3 %v70_v2  ;;  %v141_v5 = vld [vmem:[%s226_s0] sm:$0xff] }
   0x4   :  { %79 = vmatpush.bf16.msra.mxu0 %v70_v2  ;;  %145 = vmatpush.bf16.msra.mxu1 %v70_v2  ;;  %v148_v9 = vld [vmem:[%s227_s2] ss:$0 sm:$0xff] }
   0x5   :  { %v51_v7 = vpack.c.b16 %v46_v4, %v46_v4 }
   0x6   :  { %138 = vmatmul.msk.bf16.vlgmr.msra.gmra.mxu2 %vm52_vm1, %v143_v3 }
   0x7   :  { %140 = vmatmul.msk.bf16.vlgmr.msra.gmra.mxu3 %vm52_vm1, %v51_v7  ;;  %136 = vmatmul.msk.bf16.vlgmr.msra.gmra.mxu0 %vm52_vm1, %v141_v5 }
   0x8   :  { %137 = vmatmul.msk.bf16.vlgmr.msra.gmra.mxu1 %vm52_vm1, %v142_v6 }
  0x16   :  { %139 = vmatmul.msk.bf16.gmra.mxu2 %vm52_vm1, %v144_v8 }
  0x84   :  { %v81_v10 = vpop.f32.mrf.mxu0 }
  0x85   :  { %v86_v11 = vpop.f32.mrf.mxu1  ;;  %v82_v12 = vadd.f32 %v148_v9, %v81_v10 }
  0x86   :  { %v87_v13 = vadd.f32 %v148_v9, %v86_v11 }
  0x87   :  { %106 = vst.msk [vmem:[%s228_s3] sm:$0xff] %vm105_vm2, %v82_v12 }
  0x88   :  { %108 = vst.msk [vmem:[%s228_s3 + $0x10] sm:$0xff] %vm105_vm2, %v87_v13 }
  0x89   :  { %v91_v14 = vpop.f32.mrf.mxu2 }
  0x8a   :  { %v101_v15 = vpop.f32.mrf.mxu3  ;;  %v92_v16 = vadd.f32 %v148_v9, %v91_v14 }
  0x8b   :  { %v102_v17 = vadd.f32 %v148_v9, %v101_v15 }
  0x8c   :  { %110 = vst.msk [vmem:[%s228_s3 + $0x20] sm:$0xff] %vm105_vm2, %v92_v16  ;;  %v83_v18 = vpop.f32.mrf.mxu0 }
  0x8d   :  { %v88_v19 = vpop.f32.mrf.mxu1  ;;  %115 = vst.msk [vmem:[%s228_s3 + $0x40] sm:$0x3] %vm114_vm3, %v102_v17  ;;  %v84_v20 = vadd.f32 %v148_v9, %v83_v18 }
  0x8e   :  { %v89_v21 = vadd.f32 %v148_v9, %v88_v19 }
  0x8f   :  { %107 = vst.msk [vmem:[%s228_s3 + $0x8] sm:$0xff] %vm105_vm2, %v84_v20 }
  0x90   :  { %109 = vst.msk [vmem:[%s228_s3 + $0x18] sm:$0xff] %vm105_vm2, %v89_v21 }
  0x91   :  { %v93_v22 = vpop.f32.mrf.mxu2 }
  0x92   :  { %v103_v23 = vpop.f32.mrf.mxu3  ;;  %v94_v24 = vadd.f32 %v148_v9, %v93_v22 }
  0x94   :  { %111 = vst.msk [vmem:[%s228_s3 + $0x28] sm:$0xff] %vm105_vm2, %v94_v24 }
  0x99   :  { %v96_v25 = vpop.f32.mrf.mxu2 }
  0x9a   :  { %v97_v26 = vadd.f32 %v148_v9, %v96_v25 }
  0x9c   :  { %112 = vst.msk [vmem:[%s228_s3 + $0x30] sm:$0xff] %vm105_vm2, %v97_v26 }
  0xa1   :  { %v98_v27 = vpop.f32.mrf.mxu2 }
  0xa2   :  { %v99_v28 = vadd.f32 %v148_v9, %v98_v27 }
  0xa4   :  { %113 = vst.msk [vmem:[%s228_s3 + $0x38] sm:$0xff] %vm105_vm2, %v99_v28 }

</bundles_post_ra>
